<compile_context>
chip_gen: v7x
topology: tpu7x:2x2x1
jax: 0.10.0
libtpu: 0.0.40
codegen_flags: <defaults>
</compile_context>

<pallas_src>
import jax
import jax.numpy as jnp
from jax.experimental import pallas as pl
from jax.experimental.pallas import tpu as pltpu


# 32 MiB scoped VMEM is safe on v5e/v6e/v7x and lifts v5e's 16 MiB default.
_VMEM_LIMIT_BYTES = 32 * 1024 * 1024
# hw-tile target (lanes per block).  With C_in up to 1024 in f32 this keeps the
# double-buffered input block well under the scoped VMEM limit on every generation.
_HW_TILE_TARGET = 512


def _largest_divisor(total, target):
    """Largest tile <= target that divides total (keeps BlockSpecs exact)."""
    t = min(target, total)
    while total % t:
        t -= 1
    return t
    # TODO(synk): for ragged production H*W, zero-pad the spatial dim instead of
    # shrinking the tile (zero columns contribute 0 to sum/sumsq, so BN stats stay
    # exact as long as the true element count is used).


# ----------------------------- kernels ------------------------------------ #

def _stats_kernel(x_ref, w1t_ref, sum_ref, sq_ref):
    """Stem 1x1 conv (bf16 MXU matmul, f32 acc) + per-block BN partial stats.

    x_ref:   (1, C_in, hw_tile) f32
    w1t_ref: (C0, C_in)         bf16
    sum_ref: (1, 1, C0, 1)      f32   per-block sum   over spatial lanes
    sq_ref:  (1, 1, C0, 1)      f32   per-block sum of squares
    """
    x = x_ref[0].astype(jnp.bfloat16)                                   # (C_in, hw)
    t = jnp.dot(w1t_ref[...], x, preferred_element_type=jnp.float32)    # (C0, hw) f32
    sum_ref[...] = jnp.sum(t, axis=1, keepdims=True)[None, None]        # (1,1,C0,1)
    sq_ref[...] = jnp.sum(t * t, axis=1, keepdims=True)[None, None]


def _apply_kernel(x_ref, w1t_ref, scale_ref, shift_ref, w2t_ref, b2_ref, o_ref):
    """Recompute stem matmul, fuse BN-apply + SiLU + pred 1x1 conv (+bias).

    x_ref:     (1, C_in, hw_tile) f32
    w1t_ref:   (C0, C_in)         bf16
    scale_ref: (C0, 1)            f32   gamma / sqrt(var + eps)
    shift_ref: (C0, 1)            f32   beta - mean * scale
    w2t_ref:   (C_out, C0)        bf16
    b2_ref:    (C_out, 1)         f32
    o_ref:     (1, C_out, hw_tile) f32
    """
    x = x_ref[0].astype(jnp.bfloat16)                                   # (C_in, hw)
    t = jnp.dot(w1t_ref[...], x, preferred_element_type=jnp.float32)    # (C0, hw) f32
    y = t * scale_ref[...] + shift_ref[...]                             # BN (train)
    y = y * jax.nn.sigmoid(y)                                           # SiLU
    z = jnp.dot(w2t_ref[...], y.astype(jnp.bfloat16),
                preferred_element_type=jnp.float32) + b2_ref[...]       # (C_out, hw)
    o_ref[...] = z[None].astype(o_ref.dtype)


# ----------------------------- wrapper ------------------------------------ #

def aux_head_level(x_nchw, params, *, eps=1e-3, hw_tile_target=_HW_TILE_TARGET):
    """Run one level of AUXHeatmapHead. x_nchw: (N, C_in, H, W) float32."""
    N, C_in, H, W = x_nchw.shape
    HW = H * W
    x = x_nchw.reshape(N, C_in, HW)            # free reshape, stays NCHW-contiguous

    hw_tile = _largest_divisor(HW, hw_tile_target)
    num_hw = HW // hw_tile
    grid = (N, num_hw)

    C0 = params["w1"].shape[1]
    C_out = params["w2"].shape[1]

    # bf16 weights for the MXU (tiny arrays; stats/accumulation stay f32).
    w1t = jnp.asarray(params["w1"].T, jnp.bfloat16)        # (C0, C_in)
    w2t = jnp.asarray(params["w2"].T, jnp.bfloat16)        # (C_out, C0)
    gamma = params["gamma"].astype(jnp.float32)            # (C0,)
    beta = params["beta"].astype(jnp.float32)              # (C0,)
    b2 = params["b2"].astype(jnp.float32)[:, None]         # (C_out, 1)
    # TODO(synk): for the tiny test channels (<128) the MXU is under-filled; pad
    # channel dims to 128 only if this toy configuration ever becomes perf-relevant
    # (production channels 256/512/1024 are already aligned).

    stem_flops = 2 * N * HW * C_in * C0
    head_flops = stem_flops + 2 * N * HW * C0 * C_out

    cost1 = pl.CostEstimate(
        flops=int(stem_flops),
        transcendentals=0,
        bytes_accessed=int(x.size * 4 + w1t.size * 2 + 2 * N * num_hw * C0 * 4),
    )
    cost2 = pl.CostEstimate(
        flops=int(head_flops),
        transcendentals=int(N * HW * C0),
        bytes_accessed=int(x.size * 4 + w1t.size * 2 + w2t.size * 2
                           + 2 * C0 * 4 + C_out * 4 + N * C_out * HW * 4),
    )

    cparams = pltpu.CompilerParams(
        dimension_semantics=("parallel", "parallel"),
        vmem_limit_bytes=_VMEM_LIMIT_BYTES,
    )

    # Pass 1: stem matmul + per-block BN partial statistics (no t round-trip).
    sums, sqs = pl.pallas_call(
        _stats_kernel,
        out_shape=(
            jax.ShapeDtypeStruct((N, num_hw, C0, 1), jnp.float32),
            jax.ShapeDtypeStruct((N, num_hw, C0, 1), jnp.float32),
        ),
        grid_spec=pltpu.PrefetchScalarGridSpec(
            num_scalar_prefetch=0,
            grid=grid,
            in_specs=[
                pl.BlockSpec((1, C_in, hw_tile), lambda n, j: (n, 0, j)),
                pl.BlockSpec((C0, C_in), lambda n, j: (0, 0)),
            ],
            out_specs=(
                pl.BlockSpec((1, 1, C0, 1), lambda n, j: (n, j, 0, 0)),
                pl.BlockSpec((1, 1, C0, 1), lambda n, j: (n, j, 0, 0)),
            ),
        ),
        compiler_params=cparams,
        cost_estimate=cost1,
    )(x, w1t)

    # Fold BN(train) into a per-channel affine (tiny glue, stays in JAX, f32).
    count = jnp.float32(N * HW)
    ssum = jnp.sum(sums, axis=(0, 1))                      # (C0, 1)
    ssq = jnp.sum(sqs, axis=(0, 1))                        # (C0, 1)
    mean = ssum / count
    # Biased variance (BN training).  E[t^2]-E[t]^2 is clamped at 0 to guard against
    # cancellation when |mean| >> std; stats are accumulated in f32 throughout.
    var = jnp.maximum(ssq / count - mean * mean, 0.0)
    scale = gamma[:, None] / jnp.sqrt(var + eps)           # (C0, 1)
    shift = beta[:, None] - mean * scale                   # (C0, 1)

    # Pass 2: recompute stem matmul, fused BN-apply + SiLU + pred conv + bias.
    out = pl.pallas_call(
        _apply_kernel,
        out_shape=jax.ShapeDtypeStruct((N, C_out, HW), jnp.float32),
        grid_spec=pltpu.PrefetchScalarGridSpec(
            num_scalar_prefetch=0,
            grid=grid,
            in_specs=[
                pl.BlockSpec((1, C_in, hw_tile), lambda n, j: (n, 0, j)),
                pl.BlockSpec((C0, C_in), lambda n, j: (0, 0)),
                pl.BlockSpec((C0, 1), lambda n, j: (0, 0)),
                pl.BlockSpec((C0, 1), lambda n, j: (0, 0)),
                pl.BlockSpec((C_out, C0), lambda n, j: (0, 0)),
                pl.BlockSpec((C_out, 1), lambda n, j: (0, 0)),
            ],
            out_specs=pl.BlockSpec((1, C_out, hw_tile), lambda n, j: (n, 0, j)),
        ),
        compiler_params=cparams,
        cost_estimate=cost2,
    )(x, w1t, scale, shift, w2t, b2)

    return out.reshape(N, C_out, H, W)     # already NCHW; no transpose needed


def aux_heatmap_head_forward(inputs, params_per_level, in_features, *, eps=1e-3):
    """Training-mode forward: returns a list of heatmap logits per level.
    # TODO(synk): eval-mode forward is undefined in the reference module
    # (forward returns None implicitly); only the training path is implemented."""
    ys = []
    for f, p in zip(in_features, params_per_level):
        ys.append(aux_head_level(inputs[f], p, eps=eps))
    return ys


# ------------------------- deterministic params ---------------------------- #

def make_params(key, in_channels, num_heatmap):
    c0 = in_channels[0]
    c_out = num_heatmap + 1
    params = []
    for c_in in in_channels:
        k1, k2, k3, key = jax.random.split(key, 4)
        params.append({
            "w1": 0.05 * jax.random.normal(k1, (c_in, c0), jnp.float32),
            "gamma": jnp.ones((c0,), jnp.float32),
            "beta": jnp.zeros((c0,), jnp.float32),
            "w2": 0.05 * jax.random.normal(k2, (c0, c_out), jnp.float32),
            "b2": 0.01 * jax.random.normal(k3, (c_out,), jnp.float32),
        })
    return params


# ------------------------------ reference ---------------------------------- #

def _ref_level(x_nchw, p, eps):
    """Pure f32 reference matching the PyTorch module semantics."""
    N, C, H, W = x_nchw.shape
    x = jnp.transpose(x_nchw, (0, 2, 3, 1)).reshape(-1, C)
    t = x @ p["w1"]
    mean = t.mean(axis=0)
    var = ((t - mean) ** 2).mean(axis=0)           # biased (BN training)
    y = (t - mean) / jnp.sqrt(var + eps) * p["gamma"] + p["beta"]
    y = y * jax.nn.sigmoid(y)
    z = y @ p["w2"] + p["b2"]
    return z.reshape(N, H, W, -1).transpose(0, 3, 1, 2)


# --------------------------------- main ------------------------------------ #

if __name__ == "__main__":
    key = jax.random.PRNGKey(0)

    in_features = ("bev_fpn3", "bev_fpn4", "bev_fpn5")
    in_channels = [32, 64, 128]     # small analogue of [256, 512, 1024]
    num_heatmap = 4
    batch = 2
    spatial = {"bev_fpn3": 16, "bev_fpn4": 8, "bev_fpn5": 4}
    eps = 1e-3                      # YOLOX BaseConv BN eps

    kx, key = jax.random.split(key)
    inputs = {}
    for f, c in zip(in_features, in_channels):
        kx, sub = jax.random.split(kx)
        s = spatial[f]
        inputs[f] = jax.random.normal(sub, (batch, c, s, s), jnp.float32)

    params = make_params(key, in_channels, num_heatmap)

    ys = aux_heatmap_head_forward(inputs, params, in_features, eps=eps)
    ys = jax.block_until_ready(ys)

    # Correctness check vs pure-f32 JAX reference.  The kernel feeds the MXU in
    # bf16 (f32 accumulation, f32 BN stats), so a slightly loosened tolerance is
    # used versus the exact-f32 reference.
    for f, p, y in zip(in_features, params, ys):
        ref = _ref_level(inputs[f], p, eps)
        assert y.shape == (batch, num_heatmap + 1,
                           spatial[f], spatial[f]), y.shape
        assert jnp.allclose(y, ref, atol=3e-2, rtol=3e-2), f"mismatch at {f}"

    print("KERNEL_OK")
</pallas_src>

<mosaic_0001>
module attributes {stable_mosaic.version = 11 : i64} {
  func.func @_stats_kernel(%arg0: i32, %arg1: i32, %arg2: memref<1x32x256xf32, #tpu.memory_space<vmem>>, %arg3: memref<32x32xbf16, #tpu.memory_space<vmem>>, %arg4: memref<1x1x32x1xf32, #tpu.memory_space<vmem>>, %arg5: memref<1x1x32x1xf32, #tpu.memory_space<vmem>>) attributes {dimension_semantics = [#tpu.dimension_semantics<parallel>, #tpu.dimension_semantics<parallel>], iteration_bounds = array<i64: 2, 1>, scalar_prefetch = 0 : i64, scratch_operands = 0 : i64, tpu.core_type = #tpu.core_type<tc>, window_params = [{transform_indices = @transform_0, window_bounds = array<i64: 1, 32, 256>}, {pipeline_mode = #tpu.pipeline_mode<synchronous>, transform_indices = @transform_1, window_bounds = array<i64: 32, 32>}, {transform_indices = @transform_2, window_bounds = array<i64: 1, 1, 32, 1>}, {transform_indices = @transform_3, window_bounds = array<i64: 1, 1, 32, 1>}]} {
    %c0 = arith.constant 0 : index
    %c0_0 = arith.constant 0 : index
    %c0_1 = arith.constant 0 : index
    %0 = vector.load %arg2[%c0, %c0_0, %c0_1] : memref<1x32x256xf32, #tpu.memory_space<vmem>>, vector<1x32x256xf32>
    %1 = vector.shape_cast %0 : vector<1x32x256xf32> to vector<32x256xf32>
    %2 = arith.truncf %1 : vector<32x256xf32> to vector<32x256xbf16>
    %c0_2 = arith.constant 0 : index
    %c0_3 = arith.constant 0 : index
    %3 = vector.load %arg3[%c0_2, %c0_3] : memref<32x32xbf16, #tpu.memory_space<vmem>>, vector<32x32xbf16>
    %cst = arith.constant dense<0.000000e+00> : vector<32x256xf32>
    %4 = tpu.matmul %3, %2, %cst {dimension_numbers = #tpu.dot_dimension_numbers<[1], [0], [0], [1], [0, 0, 1, 1], [], []>} : vector<32x32xbf16>, vector<32x256xbf16>, vector<32x256xf32> -> vector<32x256xf32>
    %cst_4 = arith.constant dense<0.000000e+00> : vector<32xf32>
    %5 = vector.multi_reduction <add>, %4, %cst_4 [1] : vector<32x256xf32> to vector<32xf32>
    %6 = vector.shape_cast %5 : vector<32xf32> to vector<32x1xf32>
    %7 = vector.shape_cast %6 : vector<32x1xf32> to vector<1x1x32x1xf32>
    %c0_5 = arith.constant 0 : index
    %c0_6 = arith.constant 0 : index
    %c0_7 = arith.constant 0 : index
    %c0_8 = arith.constant 0 : index
    %8 = vector.load %arg4[%c0_5, %c0_6, %c0_7, %c0_8] : memref<1x1x32x1xf32, #tpu.memory_space<vmem>>, vector<1x1x32x1xf32>
    tpu.vector_store %arg4[%c0_5, %c0_6, %c0_7, %c0_8], %7 {strides = array<i32>} : memref<1x1x32x1xf32, #tpu.memory_space<vmem>>, vector<1x1x32x1xf32>,
    %9 = arith.mulf %4, %4 : vector<32x256xf32>
    %cst_9 = arith.constant dense<0.000000e+00> : vector<32xf32>
    %10 = vector.multi_reduction <add>, %9, %cst_9 [1] : vector<32x256xf32> to vector<32xf32>
    %11 = vector.shape_cast %10 : vector<32xf32> to vector<32x1xf32>
    %12 = vector.shape_cast %11 : vector<32x1xf32> to vector<1x1x32x1xf32>
    %c0_10 = arith.constant 0 : index
    %c0_11 = arith.constant 0 : index
    %c0_12 = arith.constant 0 : index
    %c0_13 = arith.constant 0 : index
    %13 = vector.load %arg5[%c0_10, %c0_11, %c0_12, %c0_13] : memref<1x1x32x1xf32, #tpu.memory_space<vmem>>, vector<1x1x32x1xf32>
    tpu.vector_store %arg5[%c0_10, %c0_11, %c0_12, %c0_13], %12 {strides = array<i32>} : memref<1x1x32x1xf32, #tpu.memory_space<vmem>>, vector<1x1x32x1xf32>,
    return
  }
  func.func @transform_0(%arg0: i32, %arg1: i32) -> (i32, i32, i32) {
    %c0_i32 = arith.constant 0 : i32
    %c0_i32_0 = arith.constant 0 : i32
    return %arg0, %c0_i32, %arg1 : i32, i32, i32
  }
  func.func @transform_1(%arg0: i32, %arg1: i32) -> (i32, i32) {
    %c0_i32 = arith.constant 0 : i32
    %c0_i32_0 = arith.constant 0 : i32
    %c0_i32_1 = arith.constant 0 : i32
    return %c0_i32, %c0_i32_0 : i32, i32
  }
  func.func @transform_2(%arg0: i32, %arg1: i32) -> (i32, i32, i32, i32) {
    %c0_i32 = arith.constant 0 : i32
    %c0_i32_0 = arith.constant 0 : i32
    %c0_i32_1 = arith.constant 0 : i32
    return %arg0, %arg1, %c0_i32, %c0_i32_0 : i32, i32, i32, i32
  }
  func.func @transform_3(%arg0: i32, %arg1: i32) -> (i32, i32, i32, i32) {
    %c0_i32 = arith.constant 0 : i32
    %c0_i32_0 = arith.constant 0 : i32
    %c0_i32_1 = arith.constant 0 : i32
    return %arg0, %arg1, %c0_i32, %c0_i32_0 : i32, i32, i32, i32
  }
}

</mosaic_0001>

<bundles_post_ra>
// kernel: tpu_custom_call.1
= control target key start
LH: loop header
LB: loop body
LE: loop exit
PB: predicated region body
PF: predicated region fallthrough
CT: control target
= control target key end

     0   :  { %9 = vsyncpa [#allocation3], 0  ;;  %s956_s0 = inlined_call_operand.hbm [shape: f32[2,32,256], index: 0, kind: input, shape index: {}]   ;;  %s957_s1 = inlined_call_operand.hbm [shape: bf16[32,32], index: 1, kind: input, shape index: {}]   ;;  %s958_s2 = inlined_call_operand.vmem [shape: f32[2,1,32,1], index: 2, kind: output, shape index: {0}]   ;;  %s959_s3 = inlined_call_operand.vmem [shape: f32[2,1,32,1], index: 3, kind: output, shape index: {1}]  }
   0x1   :  { %11 = vsyncpa [#allocation3 + $0x1], 0 }
   0x2   :  { %12 = vsyncpa [#allocation5], 0  ;;  %s787_s12 = smov 0   ;;  %s789_s13 = smov 0  }
   0x3   :  { %s791_s14 = smov 0   ;;  %s793_s15 = smov 0  }
   0x4   :  { %s795_s16 = smov 0   ;;  %s797_s17 = smov 0  }
   0x5 LB: > { %s545_s18 = sadd.s32 4294967295, %s758_s17   ;;  %p52_p0 = scmp.ne.s32.totalorder %s742_s13, %s738_s12  ;;  %s758_s17 = sphi %s797_s17, %s18_s17   ;;  %s754_s16 = sphi %s795_s16, %s976_s16   ;;  %s750_s15 = sphi %s793_s15, %s975_s15   ;;  %s746_s14 = sphi %s791_s14, %s974_s14   ;;  %s742_s13 = sphi %s789_s13, %s973_s13   ;;  %s738_s12 = sphi %s787_s12, %s972_s12  }
   0x6   : > { %p817_p1 = scmp.eq.s32.totalorder %s545_s18, 0  ;;  %p547_p2 = scmp.ge.s32.totalorder %s758_s17, 1 }
   0x7   : > { %p140_p3 = scmp.lt.s32.totalorder %s758_s17, 3  ;;  %s760_s22 = smov [#allocation4]  }
   0x8   : > { %s964_s19 = scalar_select %p817_p1, 1, 0 }
   0x9   : > { %p825_p4 = por %p817_p1, %p52_p0  ;;  %p829_p5 = pnand %p547_p2, %p140_p3 }
   0xa   : > { %s152_s23 = sshll.u32 %s760_s22, 4  ;;  %s30_s25 = sadd.s32 1, %s754_s16  ;;  %s153_s23 = int_to_ptr.vmem [resolvable:$true] %s152_s23 }
   0xb   : > { %s965_s20 = scalar_select %p825_p4, 1, 0 }
   0xc   : > { %s966_s21 = scalar_select %p829_p5, 1, 0 }
   0xd   : > { %p579_p6 = pneg %p829_p5  ;;  %s646_s28 = scalar_lea.hbm %s957_s1, 256 }
   0xe   : > { %p647_p8 = scmp.ne.s32.totalorder %s957_s1, %s646_s28  ;;  %p653_p12 = scmp.lt.u32.totalorder %s646_s28, %s957_s1 }
   0xf   : > { %p837_p7 = pnand %p579_p6, %p817_p1 }
  0x11   : > { %p648_p9 = pneg %p837_p7 }
  0x13   : > { %p649_p10 = pnand %p648_p9, %p647_p8 }
  0x15   : > { %p650_p11 = pneg %p649_p10 }
  0x17   : > { %p655_p13 = pnand %p653_p12, %p650_p11 }
  0x19   : > { %658 = shalt.err (!%p655_p13)
}
  0x1a   : > { %s659_s6 = scalar_lea.vmem %s153_s23, 256  ;;  %p667_p6 = scmp.lt.s32.totalorder %s153_s23, %s153_s23 }
  0x1b   : > { %p660_p0 = scmp.ne.s32.totalorder %s153_s23, %s659_s6  ;;  %p668_p1 = scmp.lt.s32.totalorder %s659_s6, %s659_s6 }
  0x1d   : > { %p662_p2 = pnand %p660_p0, %p648_p9  ;;  %p669_p4 = por %p668_p1, %p667_p6 }
  0x1f   : > { %p663_p3 = pneg %p662_p2 }
  0x21   : > { %p670_p5 = pnand %p669_p4, %p663_p3 }
  0x23   : > { %673 = shalt.err (!%p670_p5)
}
  0x24   : > { %s761_s7 = smov 64   ;;  %s762_s8 = smov 4  }
  0x25   : > { %582 = dma.hbm_to_vmem [thread:$0]  (!%p837_p7), %s957_s1, 256, %s153_s23, [#allocation5], %s761_s7, %s761_s7, %s762_s8  }
  0x26   : > { %p32_p1 = scmp.ge.s32.totalorder %s30_s25, 2  ;;  %s39_s11 = sadd.s32 1, %s746_s14 }
  0x27   : > { %p46_p4 = scmp.ne.s32.totalorder %s746_s14, %s742_s13  ;;  %p47_p5 = scmp.eq.s32.totalorder %s758_s17, 0 }
  0x28   : > { %s978_s25 = smov (%p32_p1, %s30_s25), 0  ;;  %p588_p9 = scmp.lt.s32.totalorder %s758_s17, 2 }
  0x29   : > { %p48_p8 = por %p47_p5, %p46_p4  ;;  %s34_s12 = ssub.s32 %s754_s16, %s978_s25 }
  0x2a   : > { %s166_s18 = sand.u32 1, %s746_s14   ;;  %p37_p10 = scmp.eq.s32.totalorder %s34_s12, 0 }
  0x2b   : > { %s550_s22 = sshll.u32 %s166_s18, 6  ;;  %s566_s26 = sshll.u32 %s754_s16, 10 }
  0x2c   : > { %s870_s27 = scalar_select %p37_p10, %s746_s14, %s39_s11  }
  0x2d   : > { %s875_s23 = scalar_lea.hbm %s956_s0, %s566_s26  ;;  %s170_s29 = scalar_lea.vmem [#allocation2], %s550_s22 }
  0x2e   : > { %s179_s30 = sshll.u32 %s170_s29, 4  ;;  %p877_p7 = pnand %p588_p9, %p48_p8  ;;  %s881_s30 = int_to_ptr.vmem [resolvable:$true] %s179_s30 }
  0x2f   : > { %s883_s5 = scalar_lea.sflag [#allocation3], %s166_s18  ;;  %s674_s6 = scalar_lea.hbm %s875_s23, 1024 }
  0x30   : > { %p675_p11 = scmp.ne.s32.totalorder %s875_s23, %s674_s6  ;;  %p676_p12 = pneg %p877_p7 }
  0x31   : > { %s679_s9 = scalar_lea.hbm %s956_s0, 2048  ;;  %p680_p2 = scmp.lt.u32.totalorder %s875_s23, %s956_s0 }
  0x32   : > { %p677_p13 = pnand %p676_p12, %p675_p11  ;;  %p681_p3 = scmp.lt.u32.totalorder %s679_s9, %s674_s6 }
  0x33   : > { %p683_p1 = scmp.lt.u32.totalorder %s674_s6, %s875_s23 }
  0x34   : > { %p678_p0 = pneg %p677_p13  ;;  %p682_p6 = por %p681_p3, %p680_p2 }
  0x36   : > { %p684_p4 = por %p683_p1, %p682_p6 }
  0x38   : > { %p685_p5 = pnand %p684_p4, %p678_p0 }
  0x3a   : > { %688 = shalt.err (!%p685_p5)
}
  0x3b   : > { %s689_s12 = scalar_lea.vmem %s881_s30, 1024  ;;  %s763_s18 = smov [#allocation2]  }
  0x3c   : > { %p690_p8 = scmp.ne.s32.totalorder %s881_s30, %s689_s12  ;;  %s694_s22 = sshll.u32 %s763_s18, 4  ;;  %s695_s22 = int_to_ptr.vmem [resolvable:$false] %s694_s22 }
  0x3d   : > { %s696_s26 = scalar_lea.vmem %s695_s22, 2048  ;;  %p697_p11 = scmp.lt.s32.totalorder %s881_s30, %s695_s22 }
  0x3e   : > { %p692_p9 = pnand %p690_p8, %p676_p12  ;;  %p698_p13 = scmp.lt.s32.totalorder %s696_s26, %s689_s12 }
  0x40   : > { %p693_p10 = pneg %p692_p9  ;;  %p699_p2 = por %p698_p13, %p697_p11 }
  0x42   : > { %p700_p3 = pnand %p699_p2, %p693_p10 }
  0x44   : > { %703 = shalt.err (!%p700_p3)
}
  0x45   : > { %s764_s24 = smov 256   ;;  %s765_s28 = smov 16  }
  0x46   : > { %586 = dma.hbm_to_vmem [thread:$0]  (!%p877_p7), %s875_s23, 1024, %s881_s30, %s883_s5, %s764_s24, %s764_s24, %s765_s28  }
  0x47   : > { %p969_p12 = scmp.ne.s32.totalorder %s966_s21, 0 }
  0x48   : > { %s193_s29 = sand.u32 (!%p969_p12), 1, %s742_s13   ;;  %p970_p0 = scmp.ne.s32.totalorder (!%p969_p12), %s965_s20, 0 }
  0x49   : > { %191 = sbr.rel (%p969_p12) target bundleno = 466 (0x1d2), region = 28  ;;  %s554_s6 = sshll.u32 (!%p969_p12), %s193_s29, 6 }
  0x4a   : > { %s194_s7 = scalar_lea.sflag (!%p969_p12), [#allocation3], %s193_s29  ;;  %s197_s8 = scalar_lea.vmem (!%p969_p12), [#allocation2], %s554_s6 }
  0x50   : > { %729 = dma.done.wait (%p970_p0), %s194_s7, 1024  }
  0x51   : > { %731 = vsyncadd (%p970_p0), %s194_s7, 4294966272  ;;  %p971_p6 = scmp.ne.s32.totalorder %s964_s19, 0 }
  0x53   : > { %733 = dma.done.wait (%p971_p6), [#allocation5], 256  }
  0x54   : > { %735 = vsyncadd (%p971_p6), [#allocation5], 4294967040  ;;  %v766_v0 = vmov 0   ;;  %v258_v1 = vld [vmem:[%s197_s8 + $0x8] sm:$0xff]  ;;  %v260_v2 = vld [vmem:[%s197_s8 + $0x18] sm:$0xff]  ;;  %vm283_vm0 = vcmask 261120  }
  0x55   : > { %322 = vmatprep.mubr.bf16.mxu0 %v766_v0  ;;  %332 = vmatprep.mubr.bf16.mxu1 %v766_v0  ;;  %v257_v3 = vld [vmem:[%s197_s8] sm:$0xff]  ;;  %v266_v4 = vpack.c.bf16 %v260_v2, %v258_v1  ;;  %v259_v5 = vld [vmem:[%s197_s8 + $0x10] sm:$0xff]  ;;  %v262_v6 = vld [vmem:[%s197_s8 + $0x28] sm:$0xff]  ;;  %p238_p7 = scmp.lt.s32.totalorder %s750_s15, 1  ;;  %vm355_vm1 = vcmask 7168  }
  0x56   : > { %v264_v7 = vld [vmem:[%s197_s8 + $0x38] sm:$0xff]  ;;  %v265_v8 = vpack.c.bf16 %v259_v5, %v257_v3  ;;  %v261_v10 = vld [vmem:[%s197_s8 + $0x20] sm:$0xff]  ;;  %v263_v11 = vld [vmem:[%s197_s8 + $0x30] sm:$0xff] }
  0x57   : > { %v268_v9 = vpack.c.bf16 %v264_v7, %v262_v6  ;;  %290 = vmatprep.subr.bf16.mxu0 %v266_v4  ;;  %569 = vmatprep.subr.bf16.mxu1 %v266_v4  ;;  %v267_v12 = vpack.c.bf16 %v263_v11, %v261_v10  ;;  %v644_v13 = vld [vmem:[#allocation4] sm:$0xff]   ;;  %v645_v14 = vld [vmem:[#allocation4 + $0x8] sm:$0xff]   ;;  %s980_s15 = smov (!%p238_p7, %s750_s15), 1 }
  0x58   : > { %291 = vmatpush1.bf16.msra.mxu0 %v265_v8  ;;  %571 = vmatpush1.bf16.msra.mxu1 %v265_v8  ;;  %s567_s19 = sshll.u32 %s980_s15, 5 }
  0x59   : > { %292 = vmatprep.subr.bf16.mxu0 %v268_v9  ;;  %570 = vmatprep.subr.bf16.mxu1 %v268_v9  ;;  %s246_s23 = scalar_lea.vmem %s958_s2, %s567_s19  ;;  %s255_s15 = scalar_lea.vmem %s959_s3, %s567_s19 }
  0x5c   : > { %293 = vmatpush1.bf16.msra.mxu0 %v267_v12  ;;  %572 = vmatpush1.bf16.msra.mxu1 %v267_v12 }
  0x5f   : > { %562 = vmatmul.mubr.msk.bf16.vlgmr.msra.gmra.mrb[0].mxu0 %vm283_vm0, %v644_v13  ;;  %563 = vmatmul.mubr.msk.bf16.vlgmr.msra.gmra.mrb[0].mxu1 %vm283_vm0, %v645_v14 }
 0x132   : > { %v324_v15 = vpop.f32.mrb[0].mxu0  ;;  %v334_v16 = vpop.f32.mrb[0].mxu1 }
 0x133   : > { %v360_v17 = vmul.f32 %v324_v15, %v324_v15  ;;  %v364_v18 = vmul.f32 %v334_v16, %v334_v16  ;;  %v326_v19 = vpop.f32.mrb[1].mxu0  ;;  %v336_v20 = vpop.f32.mrb[1].mxu1 }
 0x134   : > { %v361_v21 = vmul.f32 %v326_v19, %v326_v19  ;;  %v365_v22 = vmul.f32 %v336_v20, %v336_v20  ;;  %v328_v23 = vpop.f32.mrb[2].mxu0  ;;  %v338_v24 = vpop.f32.mrb[2].mxu1  ;;  %v349_v25 = vadd.f32 %v336_v20, %v334_v16  ;;  %v343_v26 = vadd.f32 %v326_v19, %v324_v15 }
 0x135   : > { %v362_v27 = vmul.f32 %v328_v23, %v328_v23  ;;  %v366_v28 = vmul.f32 %v338_v24, %v338_v24  ;;  %v330_v29 = vpop.f32.mrb[3].mxu0  ;;  %v340_v30 = vpop.f32.mrb[3].mxu1 }
 0x136   : > { %v346_v31 = vadd.f32 %v330_v29, %v328_v23  ;;  %v363_v32 = vmul.f32 %v330_v29, %v330_v29  ;;  %v352_v33 = vadd.f32 %v340_v30, %v338_v24  ;;  %v367_v34 = vmul.f32 %v340_v30, %v340_v30  ;;  %350 = vadd.xlane.f32.xlu1 %v349_v25 }
 0x137   : > { %344 = vadd.xlane.f32.xlu0 %v343_v26  ;;  %v368_v35 = vadd.f32 %v361_v21, %v360_v17  ;;  %v374_v36 = vadd.f32 %v365_v22, %v364_v18 }
 0x138   : > { %v371_v37 = vadd.f32 %v363_v32, %v362_v27  ;;  %v377_v38 = vadd.f32 %v367_v34, %v366_v28 }
 0x13a   : > { %353 = vadd.xlane.f32.xlu1 %v352_v33 }
 0x13b   : > { %347 = vadd.xlane.f32.xlu0 %v346_v31 }
 0x13e   : > { %372 = vadd.xlane.f32.xlu1 %v371_v37 }
 0x13f   : > { %369 = vadd.xlane.f32.xlu0 %v368_v35 }
 0x142   : > { %378 = vadd.xlane.f32.xlu1 %v377_v38 }
 0x143   : > { %375 = vadd.xlane.f32.xlu0 %v374_v36 }
 0x1c3   : > { %v351_v39 = vpop.xlane.xlu1 %350 }
 0x1c4   : > { %358 = vst.msk [vmem:[%s246_s23 + $0x10] sm:$0xff] %vm355_vm1, %v351_v39  ;;  %v345_v40 = vpop.xlane.xlu0 %344 }
 0x1c5   : > { %356 = vst.msk [vmem:[%s246_s23] sm:$0xff] %vm355_vm1, %v345_v40 }
 0x1c7   : > { %v354_v41 = vpop.xlane.xlu1 %353 }
 0x1c8   : > { %359 = vst.msk [vmem:[%s246_s23 + $0x18] sm:$0xff] %vm355_vm1, %v354_v41  ;;  %v348_v42 = vpop.xlane.xlu0 %347 }
 0x1c9   : > { %357 = vst.msk [vmem:[%s246_s23 + $0x8] sm:$0xff] %vm355_vm1, %v348_v42 }
 0x1cb   : > { %v373_v43 = vpop.xlane.xlu1 %372 }
 0x1cc   : > { %381 = vst.msk [vmem:[%s255_s15 + $0x8] sm:$0xff] %vm355_vm1, %v373_v43  ;;  %v370_v44 = vpop.xlane.xlu0 %369 }
 0x1cd   : > { %380 = vst.msk [vmem:[%s255_s15] sm:$0xff] %vm355_vm1, %v370_v44 }
 0x1cf   : > { %v379_v45 = vpop.xlane.xlu1 %378 }
 0x1d0   : > { %383 = vst.msk [vmem:[%s255_s15 + $0x18] sm:$0xff] %vm355_vm1, %v379_v45  ;;  %v376_v46 = vpop.xlane.xlu0 %375 }
 0x1d1   : > { %382 = vst.msk [vmem:[%s255_s15 + $0x10] sm:$0xff] %vm355_vm1, %v376_v46 }
 0x1d2 PF: > { %s18_s17 = sadd.s32 1, %s758_s17   ;;  %s972_s12 = smov %s742_s13 }
 0x1d3   : > { %p15_p1 = scmp.ge.s32.totalorder %s18_s17, 4   ;;  %s973_s13 = smov %s746_s14 }
 0x1d4   : > { %s974_s14 = smov %s870_s27  ;;  %s975_s15 = smov %s754_s16 }
 0x1d5   : > { %s976_s16 = smov %s978_s25  ;;  %17 = sbr.rel (!%p15_p1) target bundleno = 5 (0x5), region = 84 }
 0x1dc   :  { %437 = vsyncpa [#allocation3], 1 }
 0x1dd   :  { %439 = vsyncpa [#allocation3 + $0x1], 1 }
 0x1de   :  { %440 = vsyncpa [#allocation5], 1 }

</bundles_post_ra>
